<compile_context>
chip_gen: v6e
topology: v6e:2x2x1
jax: 0.10.0
libtpu: 0.0.40
codegen_flags: <defaults>
</compile_context>

<pallas_src>
import functools

import jax
import jax.numpy as jnp
from jax.experimental import pallas as pl
from jax.experimental.pallas import tpu as pltpu

LANE = 128      # vreg lane width
SUBLANE = 8     # f32 sublane width


def _round_up(n: int, m: int) -> int:
    return ((n + m - 1) // m) * m


def _pad_axis(a, size, axis):
    pad = size - a.shape[axis]
    if pad <= 0:
        return a
    widths = [(0, 0)] * a.ndim
    widths[axis] = (0, pad)
    return jnp.pad(a, widths)


def mlp_kernel(x_ref, w1_ref, b1_ref, w2_ref, b2_ref, w3_ref, b3_ref, o_ref):
    # One batch tile per grid step; weights/biases are VMEM-resident (constant
    # index_map).  All feature dims are padded to 128 lanes by the wrapper, so
    # every store is lane-dense and every matmul uses full MXU columns.
    x = x_ref[...]

    # Layer 1: Linear + ReLU  (MXU matmul, f32 accumulate)
    h1 = jnp.dot(x, w1_ref[...], preferred_element_type=jnp.float32) + b1_ref[...]
    h1 = jnp.maximum(h1, 0.0)

    # Layer 2: Linear + ReLU
    h2 = jnp.dot(h1, w2_ref[...], preferred_element_type=jnp.float32) + b2_ref[...]
    h2 = jnp.maximum(h2, 0.0)

    # Layer 3: Linear + Sigmoid.  exp -> EUP slot; exact reciprocal keeps
    # parity with torch.sigmoid / jax.nn.sigmoid within f32 rounding.
    z = jnp.dot(h2, w3_ref[...], preferred_element_type=jnp.float32) + b3_ref[...]
    o_ref[...] = pl.reciprocal(1.0 + jnp.exp(-z), approx=False)


@functools.partial(jax.jit, static_argnames=("block_batch",))
def neural_network_forward(x, params, *, block_batch: int = 512):
    """Forward pass of NeuralNetwork (input cast to float32, then fused MLP)."""
    x = x.astype(jnp.float32)  # matches `input_data.float()` in forward()
    w1, b1, w2, b2, w3, b3 = params

    batch, in_f = x.shape
    hidden = w1.shape[1]
    out_f = w3.shape[1]

    # --- pad feature dims to 128 lanes (lane-dense stores, full MXU columns) ---
    h_pad = _round_up(hidden, LANE)
    o_pad = _round_up(out_f, LANE)
    w1p = _pad_axis(w1, h_pad, 1)
    b1p = _pad_axis(b1, h_pad, 1)
    w2p = _pad_axis(_pad_axis(w2, h_pad, 0), h_pad, 1)
    b2p = _pad_axis(b2, h_pad, 1)
    w3p = _pad_axis(_pad_axis(w3, h_pad, 0), o_pad, 1)
    b3p = _pad_axis(b3, o_pad, 1)

    # --- pad / tile the batch axis ---------------------------------------------
    tm = min(block_batch, _round_up(batch, SUBLANE))
    tm = _round_up(tm, SUBLANE)
    padded_batch = _round_up(batch, tm)
    xp = _pad_axis(x, padded_batch, 0)
    grid = (padded_batch // tm,)

    # Advisory cost estimate for XLA's scheduler.
    flops = 2 * padded_batch * (in_f * h_pad + h_pad * h_pad + h_pad * o_pad)
    bytes_accessed = 4 * (
        padded_batch * (in_f + o_pad)
        + in_f * h_pad + h_pad * h_pad + h_pad * o_pad
        + 2 * h_pad + o_pad
    )
    cost = pl.CostEstimate(
        flops=flops,
        transcendentals=padded_batch * o_pad,
        bytes_accessed=bytes_accessed,
    )

    const = lambda i: (0, 0)  # weights/biases: same block every grid step
    out = pl.pallas_call(
        mlp_kernel,
        out_shape=jax.ShapeDtypeStruct((padded_batch, o_pad), jnp.float32),
        grid=grid,
        in_specs=[
            pl.BlockSpec((tm, in_f), lambda i: (i, 0)),     # x: batch-tiled
            pl.BlockSpec((in_f, h_pad), const),             # w1
            pl.BlockSpec((1, h_pad), const),                # b1
            pl.BlockSpec((h_pad, h_pad), const),            # w2
            pl.BlockSpec((1, h_pad), const),                # b2
            pl.BlockSpec((h_pad, o_pad), const),            # w3
            pl.BlockSpec((1, o_pad), const),                # b3
        ],
        out_specs=pl.BlockSpec((tm, o_pad), lambda i: (i, 0)),
        compiler_params=pltpu.CompilerParams(
            dimension_semantics=("parallel",),              # v7x: 2 TCs
        ),
        cost_estimate=cost,
    )(xp, w1p, b1p, w2p, b2p, w3p, b3p)

    # Slice back to logical shape (drop batch padding and padded output lanes).
    return out[:batch, :out_f]


def init_params(key, in_features, hidden, out_features):
    """Deterministic PyTorch-style Linear init: U(-1/sqrt(fan_in), 1/sqrt(fan_in))."""
    ks = jax.random.split(key, 6)

    def lin(kw, kb, fan_in, fan_out):
        bound = 1.0 / jnp.sqrt(fan_in)
        w = jax.random.uniform(kw, (fan_in, fan_out), jnp.float32, -bound, bound)
        b = jax.random.uniform(kb, (1, fan_out), jnp.float32, -bound, bound)
        return w, b

    w1, b1 = lin(ks[0], ks[1], in_features, hidden)
    w2, b2 = lin(ks[2], ks[3], hidden, hidden)
    w3, b3 = lin(ks[4], ks[5], hidden, out_features)
    return (w1, b1, w2, b2, w3, b3)


if __name__ == "__main__":
    key = jax.random.PRNGKey(0)
    k_in, k_params = jax.random.split(key)

    # Small but multi-tile: batch=256 with block_batch=128 -> 2 grid steps,
    # exercising the pipelined batch grid.
    batch, in_features, hidden, out_features = 256, 32, 64, 16

    x = jax.random.normal(k_in, (batch, in_features), dtype=jnp.float32)
    params = init_params(k_params, in_features, hidden, out_features)

    out = neural_network_forward(x, params, block_batch=128)
    jax.block_until_ready(out)

    # Reference check in plain JAX (same math, no Pallas).
    w1, b1, w2, b2, w3, b3 = params
    h1 = jnp.maximum(x @ w1 + b1, 0.0)
    h2 = jnp.maximum(h1 @ w2 + b2, 0.0)
    ref = jax.nn.sigmoid(h2 @ w3 + b3)
    assert out.shape == (batch, out_features)
    assert jnp.allclose(out, ref, atol=1e-5, rtol=1e-5)

    print("KERNEL_OK")
</pallas_src>

<mosaic_0001>
module attributes {stable_mosaic.version = 11 : i64} {
  func.func @mlp_kernel(%arg0: i32, %arg1: memref<128x32xf32, #tpu.memory_space<vmem>>, %arg2: memref<32x128xf32, #tpu.memory_space<vmem>>, %arg3: memref<1x128xf32, #tpu.memory_space<vmem>>, %arg4: memref<128x128xf32, #tpu.memory_space<vmem>>, %arg5: memref<1x128xf32, #tpu.memory_space<vmem>>, %arg6: memref<128x128xf32, #tpu.memory_space<vmem>>, %arg7: memref<1x128xf32, #tpu.memory_space<vmem>>, %arg8: memref<128x128xf32, #tpu.memory_space<vmem>>) attributes {dimension_semantics = [#tpu.dimension_semantics<parallel>], iteration_bounds = array<i64: 2>, scalar_prefetch = 0 : i64, scratch_operands = 0 : i64, tpu.core_type = #tpu.core_type<tc>, window_params = [{transform_indices = @transform_0, window_bounds = array<i64: 128, 32>}, {pipeline_mode = #tpu.pipeline_mode<synchronous>, transform_indices = @transform_1, window_bounds = array<i64: 32, 128>}, {pipeline_mode = #tpu.pipeline_mode<synchronous>, transform_indices = @transform_2, window_bounds = array<i64: 1, 128>}, {pipeline_mode = #tpu.pipeline_mode<synchronous>, transform_indices = @transform_3, window_bounds = array<i64: 128, 128>}, {pipeline_mode = #tpu.pipeline_mode<synchronous>, transform_indices = @transform_4, window_bounds = array<i64: 1, 128>}, {pipeline_mode = #tpu.pipeline_mode<synchronous>, transform_indices = @transform_5, window_bounds = array<i64: 128, 128>}, {pipeline_mode = #tpu.pipeline_mode<synchronous>, transform_indices = @transform_6, window_bounds = array<i64: 1, 128>}, {transform_indices = @transform_7, window_bounds = array<i64: 128, 128>}]} {
    %c0 = arith.constant 0 : index
    %c0_0 = arith.constant 0 : index
    %0 = vector.load %arg1[%c0, %c0_0] : memref<128x32xf32, #tpu.memory_space<vmem>>, vector<128x32xf32>
    %c0_1 = arith.constant 0 : index
    %c0_2 = arith.constant 0 : index
    %1 = vector.load %arg2[%c0_1, %c0_2] : memref<32x128xf32, #tpu.memory_space<vmem>>, vector<32x128xf32>
    %cst = arith.constant dense<0.000000e+00> : vector<128x128xf32>
    %2 = tpu.matmul %0, %1, %cst {dimension_numbers = #tpu.dot_dimension_numbers<[1], [0], [0], [1], [0, 0, 1, 1], [], []>} : vector<128x32xf32>, vector<32x128xf32>, vector<128x128xf32> -> vector<128x128xf32>
    %c0_3 = arith.constant 0 : index
    %c0_4 = arith.constant 0 : index
    %3 = vector.load %arg3[%c0_3, %c0_4] : memref<1x128xf32, #tpu.memory_space<vmem>>, vector<1x128xf32>
    %4 = vector.broadcast %3 : vector<1x128xf32> to vector<128x128xf32>
    %5 = arith.addf %2, %4 : vector<128x128xf32>
    %cst_5 = arith.constant 0.000000e+00 : f32
    %6 = vector.broadcast %cst_5 : f32 to vector<128x128xf32>
    %7 = arith.maximumf %5, %6 : vector<128x128xf32>
    %c0_6 = arith.constant 0 : index
    %c0_7 = arith.constant 0 : index
    %8 = vector.load %arg4[%c0_6, %c0_7] : memref<128x128xf32, #tpu.memory_space<vmem>>, vector<128x128xf32>
    %cst_8 = arith.constant dense<0.000000e+00> : vector<128x128xf32>
    %9 = tpu.matmul %7, %8, %cst_8 {dimension_numbers = #tpu.dot_dimension_numbers<[1], [0], [0], [1], [0, 0, 1, 1], [], []>} : vector<128x128xf32>, vector<128x128xf32>, vector<128x128xf32> -> vector<128x128xf32>
    %c0_9 = arith.constant 0 : index
    %c0_10 = arith.constant 0 : index
    %10 = vector.load %arg5[%c0_9, %c0_10] : memref<1x128xf32, #tpu.memory_space<vmem>>, vector<1x128xf32>
    %11 = vector.broadcast %10 : vector<1x128xf32> to vector<128x128xf32>
    %12 = arith.addf %9, %11 : vector<128x128xf32>
    %cst_11 = arith.constant 0.000000e+00 : f32
    %13 = vector.broadcast %cst_11 : f32 to vector<128x128xf32>
    %14 = arith.maximumf %12, %13 : vector<128x128xf32>
    %c0_12 = arith.constant 0 : index
    %c0_13 = arith.constant 0 : index
    %15 = vector.load %arg6[%c0_12, %c0_13] : memref<128x128xf32, #tpu.memory_space<vmem>>, vector<128x128xf32>
    %cst_14 = arith.constant dense<0.000000e+00> : vector<128x128xf32>
    %16 = tpu.matmul %14, %15, %cst_14 {dimension_numbers = #tpu.dot_dimension_numbers<[1], [0], [0], [1], [0, 0, 1, 1], [], []>} : vector<128x128xf32>, vector<128x128xf32>, vector<128x128xf32> -> vector<128x128xf32>
    %c0_15 = arith.constant 0 : index
    %c0_16 = arith.constant 0 : index
    %17 = vector.load %arg7[%c0_15, %c0_16] : memref<1x128xf32, #tpu.memory_space<vmem>>, vector<1x128xf32>
    %18 = vector.broadcast %17 : vector<1x128xf32> to vector<128x128xf32>
    %19 = arith.addf %16, %18 : vector<128x128xf32>
    %cst_17 = arith.constant 0.000000e+00 : f32
    %20 = vector.broadcast %cst_17 : f32 to vector<128x128xf32>
    %21 = arith.subf %20, %19 : vector<128x128xf32>
    %22 = math.exp %21 : vector<128x128xf32>
    %cst_18 = arith.constant 1.000000e+00 : f32
    %23 = vector.broadcast %cst_18 : f32 to vector<128x128xf32>
    %24 = arith.addf %23, %22 : vector<128x128xf32>
    %25 = tpu.reciprocal %24 : vector<128x128xf32> -> vector<128x128xf32>
    %c0_19 = arith.constant 0 : index
    %c0_20 = arith.constant 0 : index
    %26 = vector.load %arg8[%c0_19, %c0_20] : memref<128x128xf32, #tpu.memory_space<vmem>>, vector<128x128xf32>
    tpu.vector_store %arg8[%c0_19, %c0_20], %25 {strides = array<i32>} : memref<128x128xf32, #tpu.memory_space<vmem>>, vector<128x128xf32>,
    return
  }
  func.func @transform_0(%arg0: i32) -> (i32, i32) {
    %c0_i32 = arith.constant 0 : i32
    %c0_i32_0 = arith.constant 0 : i32
    return %arg0, %c0_i32 : i32, i32
  }
  func.func @transform_1(%arg0: i32) -> (i32, i32) {
    %c0_i32 = arith.constant 0 : i32
    %c0_i32_0 = arith.constant 0 : i32
    %c0_i32_1 = arith.constant 0 : i32
    return %c0_i32, %c0_i32_0 : i32, i32
  }
  func.func @transform_2(%arg0: i32) -> (i32, i32) {
    %c0_i32 = arith.constant 0 : i32
    %c0_i32_0 = arith.constant 0 : i32
    %c0_i32_1 = arith.constant 0 : i32
    return %c0_i32, %c0_i32_0 : i32, i32
  }
  func.func @transform_3(%arg0: i32) -> (i32, i32) {
    %c0_i32 = arith.constant 0 : i32
    %c0_i32_0 = arith.constant 0 : i32
    %c0_i32_1 = arith.constant 0 : i32
    return %c0_i32, %c0_i32_0 : i32, i32
  }
  func.func @transform_4(%arg0: i32) -> (i32, i32) {
    %c0_i32 = arith.constant 0 : i32
    %c0_i32_0 = arith.constant 0 : i32
    %c0_i32_1 = arith.constant 0 : i32
    return %c0_i32, %c0_i32_0 : i32, i32
  }
  func.func @transform_5(%arg0: i32) -> (i32, i32) {
    %c0_i32 = arith.constant 0 : i32
    %c0_i32_0 = arith.constant 0 : i32
    %c0_i32_1 = arith.constant 0 : i32
    return %c0_i32, %c0_i32_0 : i32, i32
  }
  func.func @transform_6(%arg0: i32) -> (i32, i32) {
    %c0_i32 = arith.constant 0 : i32
    %c0_i32_0 = arith.constant 0 : i32
    %c0_i32_1 = arith.constant 0 : i32
    return %c0_i32, %c0_i32_0 : i32, i32
  }
  func.func @transform_7(%arg0: i32) -> (i32, i32) {
    %c0_i32 = arith.constant 0 : i32
    %c0_i32_0 = arith.constant 0 : i32
    return %arg0, %c0_i32 : i32, i32
  }
}

</mosaic_0001>

<bundles_post_ra>
// kernel: neural_network_forward.1
= control target key start
LH: loop header
LB: loop body
LE: loop exit
PB: predicated region body
PF: predicated region fallthrough
CT: control target
= control target key end

     0   :  { %s1433_s24 = smov 0   ;;  %s1710_s0 = inlined_call_operand.vmem [shape: f32[256,32], index: 0, kind: input, shape index: {}]   ;;  %s1711_s1 = inlined_call_operand.vmem [shape: f32[32,128], index: 1, kind: input, shape index: {}]   ;;  %s1712_s2 = inlined_call_operand.vmem [shape: f32[1,128], index: 2, kind: input, shape index: {}]   ;;  %s1713_s3 = inlined_call_operand.vmem [shape: f32[128,128], index: 3, kind: input, shape index: {}]   ;;  %s1714_s4 = inlined_call_operand.vmem [shape: f32[1,128], index: 4, kind: input, shape index: {}]   ;;  %s1715_s5 = inlined_call_operand.vmem [shape: f32[128,128], index: 5, kind: input, shape index: {}]   ;;  %s1716_s6 = inlined_call_operand.vmem [shape: f32[1,128], index: 6, kind: input, shape index: {}]   ;;  %s1717_s7 = inlined_call_operand.vmem [shape: f32[256,128], index: 7, kind: output, shape index: {}]  }
   0x1 LB: > { %s1023_s25 = sadd.s32 4294967295, %s1391_s24   ;;  %p1027_p0 = scmp.ge.s32.totalorder %s1391_s24, 1  ;;  %s1391_s24 = sphi %s1433_s24, %s17_s24  }
   0x2   : > { %p238_p1 = scmp.lt.s32.totalorder %s1391_s24, 3 }
   0x4   : > { %p239_p2 = pnand %p1027_p0, %p238_p1 }
   0x5   : > { %s1028_s30 = sshll.u32 (!%p239_p2), %s1023_s25, 4 }
   0x6   : > { %242 = sbr.rel (%p239_p2) target bundleno = 681 (0x2a9), region = 48  ;;  %p271_p3 = scmp.lt.s32.totalorder (!%p239_p2), %s1028_s30, 31 }
   0xb   : > { %v301_v0 = vld [vmem:[%s1711_s1 + $0x18] sm:$0xff]  ;;  %v300_v1 = vld [vmem:[%s1711_s1 + $0x10] sm:$0xff]  ;;  %v299_v4 = vld [vmem:[%s1711_s1 + $0x8] sm:$0xff]  ;;  %s1719_s30 = smov (!%p271_p3, %s1028_s30), 31  ;;  %vm309_vm0 = vcmask 261120  }
   0xc   : > { %1137 = vmatprep.subr.mxu0 %v301_v0  ;;  %v534_v2 = vld [vmem:[%s1713_s3 + $0x78] sm:$0xff]  ;;  %v533_v3 = vld [vmem:[%s1713_s3 + $0x70] sm:$0xff]  ;;  %v532_v5 = vld [vmem:[%s1713_s3 + $0x68] sm:$0xff]  ;;  %s1029_s18 = sshll.u32 %s1719_s30, 3 }
   0xd   : > { %1138 = vmatpush3.msra.mxu0 %v301_v0  ;;  %1169 = vmatprep.subr.mxu1 %v534_v2  ;;  %v298_v6 = vld [vmem:[%s1711_s1] sm:$0xff]  ;;  %s1470_s21 = scalar_lea.vmem %s1710_s0, %s1029_s18  ;;  %v530_v11 = vld [vmem:[%s1713_s3 + $0x58] sm:$0xff]  ;;  %v529_v13 = vld [vmem:[%s1713_s3 + $0x50] sm:$0xff]  ;;  %s1689_s29 = scalar_lea.vmem %s1717_s7, %s1029_s18 }
   0xe   : > { %1139 = vmatprep.subr.mxu0 %v300_v1  ;;  %1170 = vmatpush3.msra.mxu1 %v534_v2  ;;  %v531_v7 = vld [vmem:[%s1713_s3 + $0x60] sm:$0xff]  ;;  %v283_v9 = vld [vmem:[%s1470_s21 + $0x8] sm:$0xff]  ;;  %v284_v10 = vld [vmem:[%s1470_s21 + $0x10] sm:$0xff] }
   0xf   : > { %1140 = vmatpush3.msra.mxu0 %v300_v1  ;;  %1171 = vmatprep.subr.mxu1 %v533_v3  ;;  %v282_v8 = vld [vmem:[%s1470_s21] sm:$0xff]  ;;  %v285_v12 = vld [vmem:[%s1470_s21 + $0x18] sm:$0xff]  ;;  %v528_v15 = vld [vmem:[%s1713_s3 + $0x48] sm:$0xff] }
  0x10   : > { %1141 = vmatprep.subr.mxu0 %v299_v4  ;;  %1172 = vmatpush3.msra.mxu1 %v533_v3  ;;  %v286_v14 = vld [vmem:[%s1470_s21 + $0x20] sm:$0xff]  ;;  %v287_v16 = vld [vmem:[%s1470_s21 + $0x28] sm:$0xff]  ;;  %v288_v18 = vld [vmem:[%s1470_s21 + $0x30] sm:$0xff] }
  0x11   : > { %1142 = vmatpush3.msra.mxu0 %v299_v4  ;;  %1173 = vmatprep.subr.mxu1 %v532_v5  ;;  %v527_v17 = vld [vmem:[%s1713_s3 + $0x40] sm:$0xff]  ;;  %v526_v19 = vld [vmem:[%s1713_s3 + $0x38] sm:$0xff]  ;;  %v525_v21 = vld [vmem:[%s1713_s3 + $0x30] sm:$0xff] }
  0x12   : > { %1143 = vmatprep.subr.mxu0 %v298_v6  ;;  %1174 = vmatpush3.msra.mxu1 %v532_v5  ;;  %v289_v20 = vld [vmem:[%s1470_s21 + $0x38] sm:$0xff]  ;;  %v290_v22 = vld [vmem:[%s1470_s21 + $0x40] sm:$0xff]  ;;  %v524_v23 = vld [vmem:[%s1713_s3 + $0x28] sm:$0xff] }
  0x13   : > { %1144 = vmatpush3.msra.mxu0 %v298_v6  ;;  %1145 = vmatprep.mubr.msk.f32.mxu0 %vm309_vm0, %v282_v8  ;;  %v291_v24 = vld [vmem:[%s1470_s21 + $0x48] sm:$0xff]  ;;  %v523_v25 = vld [vmem:[%s1713_s3 + $0x20] sm:$0xff]  ;;  %v292_v26 = vld [vmem:[%s1470_s21 + $0x50] sm:$0xff] }
  0x14   : > { %1146 = vmatmul.mubr.msk.f32.vlgmr.msra.gmra.mxu0 %vm309_vm0, %v283_v9  ;;  %1175 = vmatprep.subr.mxu1 %v531_v7  ;;  %v293_v27 = vld [vmem:[%s1470_s21 + $0x58] sm:$0xff]  ;;  %v294_v28 = vld [vmem:[%s1470_s21 + $0x60] sm:$0xff]  ;;  %v295_v29 = vld [vmem:[%s1470_s21 + $0x68] sm:$0xff] }
  0x15   : > { %1148 = vmatprep.mubr.msk.f32.mxu0 %vm309_vm0, %v284_v10  ;;  %1176 = vmatpush3.msra.mxu1 %v531_v7  ;;  %v296_v30 = vld [vmem:[%s1470_s21 + $0x70] sm:$0xff]  ;;  %v297_v31 = vld [vmem:[%s1470_s21 + $0x78] sm:$0xff]  ;;  %v520_v34 = vld [vmem:[%s1713_s3 + $0x8] sm:$0xff] }
  0x16   : > { %1177 = vmatprep.subr.mxu1 %v530_v11  ;;  %v522_v32 = vld [vmem:[%s1713_s3 + $0x18] sm:$0xff]  ;;  %v521_v33 = vld [vmem:[%s1713_s3 + $0x10] sm:$0xff]  ;;  %v519_v35 = vld [vmem:[%s1713_s3] sm:$0xff] }
  0x17   : > { %1178 = vmatpush3.msra.mxu1 %v530_v11  ;;  %v718_v36 = vld [vmem:[%s1715_s5 + $0x78] sm:$0xff]  ;;  %v717_v37 = vld [vmem:[%s1715_s5 + $0x70] sm:$0xff]  ;;  %v716_v38 = vld [vmem:[%s1715_s5 + $0x68] sm:$0xff] }
  0x18   : > { %1149 = vmatmul.mubr.msk.f32.gmra.mxu0 %vm309_vm0, %v285_v12  ;;  %1179 = vmatprep.subr.mxu1 %v529_v13  ;;  %v715_v39 = vld [vmem:[%s1715_s5 + $0x60] sm:$0xff]  ;;  %v1558_v40 = vld [vmem:[%s1715_s5 + $0x58] sm:$0xff]  ;;  %v1563_v41 = vld [vmem:[%s1715_s5 + $0x50] sm:$0xff] }
  0x19   : > { %1151 = vmatprep.mubr.msk.f32.mxu0 %vm309_vm0, %v286_v14  ;;  %1180 = vmatpush3.msra.mxu1 %v529_v13  ;;  %v1570_v42 = vld [vmem:[%s1715_s5 + $0x48] sm:$0xff]  ;;  %v1577_v43 = vld [vmem:[%s1715_s5 + $0x40] sm:$0xff]  ;;  %v1584_v44 = vld [vmem:[%s1715_s5 + $0x38] sm:$0xff] }
  0x1a   : > { %1181 = vmatprep.subr.mxu1 %v528_v15  ;;  %1225 = vmatprep.subr.mxu0 %v718_v36  ;;  %v1591_v45 = vld [vmem:[%s1715_s5 + $0x30] sm:$0xff]  ;;  %v1598_v46 = vld [vmem:[%s1715_s5 + $0x28] sm:$0xff]  ;;  %v1605_v47 = vld [vmem:[%s1715_s5 + $0x20] sm:$0xff] }
  0x1b   : > { %1182 = vmatpush3.msra.mxu1 %v528_v15  ;;  %1226 = vmatpush3.msra.mxu0 %v718_v36  ;;  %v1614_v48 = vld [vmem:[%s1712_s2] ss:$0 sm:$0xff] }
  0x1c   : > { %1152 = vmatmul.mubr.msk.f32.gmra.mxu0 %vm309_vm0, %v287_v16  ;;  %1183 = vmatprep.subr.mxu1 %v527_v17 }
  0x1d   : > { %1154 = vmatprep.mubr.msk.f32.mxu0 %vm309_vm0, %v288_v18  ;;  %1184 = vmatpush3.msra.mxu1 %v527_v17 }
  0x1e   : > { %1185 = vmatprep.subr.mxu1 %v526_v19  ;;  %1227 = vmatprep.subr.mxu0 %v717_v37 }
  0x1f   : > { %1186 = vmatpush3.msra.mxu1 %v526_v19  ;;  %1228 = vmatpush3.msra.mxu0 %v717_v37 }
  0x20   : > { %1155 = vmatmul.mubr.msk.f32.gmra.mxu0 %vm309_vm0, %v289_v20  ;;  %1187 = vmatprep.subr.mxu1 %v525_v21 }
  0x21   : > { %1157 = vmatprep.mubr.msk.f32.mxu0 %vm309_vm0, %v290_v22  ;;  %1188 = vmatpush3.msra.mxu1 %v525_v21 }
  0x22   : > { %1189 = vmatprep.subr.mxu1 %v524_v23  ;;  %1229 = vmatprep.subr.mxu0 %v716_v38 }
  0x23   : > { %1190 = vmatpush3.msra.mxu1 %v524_v23  ;;  %1230 = vmatpush3.msra.mxu0 %v716_v38 }
  0x24   : > { %1158 = vmatmul.mubr.msk.f32.gmra.mxu0 %vm309_vm0, %v291_v24  ;;  %1191 = vmatprep.subr.mxu1 %v523_v25 }
  0x25   : > { %1160 = vmatprep.mubr.msk.f32.mxu0 %vm309_vm0, %v292_v26  ;;  %1192 = vmatpush3.msra.mxu1 %v523_v25 }
  0x26   : > { %1193 = vmatprep.subr.mxu1 %v522_v32  ;;  %1231 = vmatprep.subr.mxu0 %v715_v39 }
  0x27   : > { %1194 = vmatpush3.msra.mxu1 %v522_v32  ;;  %1232 = vmatpush3.msra.mxu0 %v715_v39 }
  0x28   : > { %1161 = vmatmul.mubr.msk.f32.gmra.mxu0 %vm309_vm0, %v293_v27  ;;  %1195 = vmatprep.subr.mxu1 %v521_v33 }
  0x29   : > { %1163 = vmatprep.mubr.msk.f32.mxu0 %vm309_vm0, %v294_v28  ;;  %1196 = vmatpush3.msra.mxu1 %v521_v33  ;;  %v706_v33 = vld [vmem:[%s1715_s5 + $0x18] sm:$0xff] }
  0x2a   : > { %1197 = vmatprep.subr.mxu1 %v520_v34  ;;  %1233 = vmatprep.subr.mxu0 %v1558_v40 }
  0x2b   : > { %1198 = vmatpush3.msra.mxu1 %v520_v34  ;;  %1234 = vmatpush3.msra.mxu0 %v1558_v40  ;;  %v705_v34 = vld [vmem:[%s1715_s5 + $0x10] sm:$0xff] }
  0x2c   : > { %1164 = vmatmul.mubr.msk.f32.gmra.mxu0 %vm309_vm0, %v295_v29  ;;  %1199 = vmatprep.subr.mxu1 %v519_v35 }
  0x2d   : > { %1166 = vmatprep.mubr.msk.f32.mxu0 %vm309_vm0, %v296_v30  ;;  %1200 = vmatpush3.msra.mxu1 %v519_v35  ;;  %v704_v35 = vld [vmem:[%s1715_s5 + $0x8] sm:$0xff] }
  0x2e   : > { %1281 = vmatprep.subr.mxu1 %v718_v36  ;;  %1235 = vmatprep.subr.mxu0 %v1563_v41 }
  0x2f   : > { %1236 = vmatpush3.msra.mxu0 %v1563_v41 }
  0x30   : > { %1167 = vmatmul.mubr.msk.f32.gmra.mxu0 %vm309_vm0, %v297_v31  ;;  %1237 = vmatprep.subr.mxu0 %v1570_v42 }
  0x31   : > { %1238 = vmatpush3.msra.mxu0 %v1570_v42 }
  0x32   : > { %1239 = vmatprep.subr.mxu0 %v1577_v43 }
  0x33   : > { %1240 = vmatpush3.msra.mxu0 %v1577_v43 }
  0x34   : > { %1241 = vmatprep.subr.mxu0 %v1584_v44 }
  0x35   : > { %1242 = vmatpush3.msra.mxu0 %v1584_v44 }
  0x36   : > { %1243 = vmatprep.subr.mxu0 %v1591_v45 }
  0x37   : > { %1244 = vmatpush3.msra.mxu0 %v1591_v45 }
  0x38   : > { %1245 = vmatprep.subr.mxu0 %v1598_v46 }
  0x39   : > { %1246 = vmatpush3.msra.mxu0 %v1598_v46 }
  0x3a   : > { %1247 = vmatprep.subr.mxu0 %v1605_v47 }
  0x3b   : > { %1248 = vmatpush3.msra.mxu0 %v1605_v47 }
  0x3c   : > { %1249 = vmatprep.subr.mxu0 %v706_v33 }
  0x3d   : > { %1250 = vmatpush3.msra.mxu0 %v706_v33 }
  0x3e   : > { %1251 = vmatprep.subr.mxu0 %v705_v34 }
  0x3f   : > { %1252 = vmatpush3.msra.mxu0 %v705_v34 }
  0x40   : > { %1253 = vmatprep.subr.mxu0 %v704_v35 }
  0x41   : > { %1254 = vmatpush3.msra.mxu0 %v704_v35 }
  0xd4   : > { %v1147_v49 = vpop.f32.mrf.mxu0 }
  0xd5   : > { %v430_v50 = vadd.f32 %v1147_v49, %v1614_v48 }
  0xd6   : > { %v424_v51 = vpop.f32.mrf.mxu0 }
  0xd7   : > { %v425_v52 = vadd.f32 %v1614_v48, %v424_v51  ;;  %v504_v55 = vmax.f32 %v430_v50, 0.0 }
  0xd8   : > { %v1150_v53 = vpop.f32.mrf.mxu0 }
  0xd9   : > { %v503_v54 = vmax.f32 %v425_v52, 0.0  ;;  %v440_v56 = vadd.f32 %v1150_v53, %v1614_v48 }
  0xda   : > { %v434_v57 = vpop.f32.mrf.mxu0 }
  0xdb   : > { %v435_v58 = vadd.f32 %v1614_v48, %v434_v57  ;;  %1201 = vmatprep.mubr.f32.mxu1 %v503_v54  ;;  %v506_v61 = vmax.f32 %v440_v56, 0.0 }
  0xdc   : > { %v1153_v59 = vpop.f32.mrf.mxu0  ;;  %1202 = vmatmul.mubr.f32.vlgmr.msra.gmra.mxu1 %v504_v55 }
  0xdd   : > { %v505_v60 = vmax.f32 %v435_v58, 0.0  ;;  %1297 = vmatpush3.msra.mxu1 %v718_v36  ;;  %v450_v62 = vadd.f32 %v1153_v59, %v1614_v48  ;;  %v703_v36 = vld [vmem:[%s1715_s5] sm:$0xff] }
  0xde   : > { %v444_v63 = vpop.f32.mrf.mxu0  ;;  %1282 = vmatprep.subr.mxu1 %v717_v37  ;;  %1255 = vmatprep.subr.mxu0 %v703_v36 }
  0xdf   : > { %v445_v0 = vadd.f32 %v1614_v48, %v444_v63  ;;  %1204 = vmatprep.mubr.f32.mxu1 %v505_v60  ;;  %1298 = vmatpush3.msra.mxu1 %v717_v37  ;;  %v508_v3 = vmax.f32 %v450_v62, 0.0  ;;  %v1049_v37 = vld [vmem:[%s1714_s4] ss:$0 sm:$0xff] }
  0xe0   : > { %v1156_v1 = vpop.f32.mrf.mxu0  ;;  %1205 = vmatmul.mubr.f32.gmra.mxu1 %v506_v61  ;;  %1283 = vmatprep.subr.mxu1 %v716_v38 }
  0xe1   : > { %v507_v2 = vmax.f32 %v445_v0, 0.0  ;;  %1299 = vmatpush3.msra.mxu1 %v716_v38  ;;  %v460_v4 = vadd.f32 %v1156_v1, %v1614_v48  ;;  %1256 = vmatpush3.msra.mxu0 %v703_v36 }
  0xe2   : > { %v454_v5 = vpop.f32.mrf.mxu0  ;;  %1284 = vmatprep.subr.mxu1 %v715_v39 }
  0xe3   : > { %v455_v6 = vadd.f32 %v1614_v48, %v454_v5  ;;  %1207 = vmatprep.mubr.f32.mxu1 %v507_v2  ;;  %1300 = vmatpush3.msra.mxu1 %v715_v39  ;;  %v510_v9 = vmax.f32 %v460_v4, 0.0 }
  0xe4   : > { %v1159_v7 = vpop.f32.mrf.mxu0  ;;  %1208 = vmatmul.mubr.f32.gmra.mxu1 %v508_v3  ;;  %1285 = vmatprep.subr.mxu1 %v1558_v40 }
  0xe5   : > { %v509_v8 = vmax.f32 %v455_v6, 0.0  ;;  %1301 = vmatpush3.msra.mxu1 %v1558_v40  ;;  %v470_v10 = vadd.f32 %v1159_v7, %v1614_v48 }
  0xe6   : > { %v464_v11 = vpop.f32.mrf.mxu0  ;;  %1286 = vmatprep.subr.mxu1 %v1563_v41 }
  0xe7   : > { %v465_v12 = vadd.f32 %v1614_v48, %v464_v11  ;;  %1210 = vmatprep.mubr.f32.mxu1 %v509_v8  ;;  %1302 = vmatpush3.msra.mxu1 %v1563_v41  ;;  %v512_v15 = vmax.f32 %v470_v10, 0.0 }
  0xe8   : > { %v1162_v13 = vpop.f32.mrf.mxu0  ;;  %1211 = vmatmul.mubr.f32.gmra.mxu1 %v510_v9  ;;  %1287 = vmatprep.subr.mxu1 %v1570_v42 }
  0xe9   : > { %v511_v14 = vmax.f32 %v465_v12, 0.0  ;;  %1303 = vmatpush3.msra.mxu1 %v1570_v42  ;;  %v480_v16 = vadd.f32 %v1162_v13, %v1614_v48 }
  0xea   : > { %v474_v17 = vpop.f32.mrf.mxu0  ;;  %1288 = vmatprep.subr.mxu1 %v1577_v43 }
  0xeb   : > { %v475_v18 = vadd.f32 %v1614_v48, %v474_v17  ;;  %1213 = vmatprep.mubr.f32.mxu1 %v511_v14  ;;  %1304 = vmatpush3.msra.mxu1 %v1577_v43  ;;  %v514_v21 = vmax.f32 %v480_v16, 0.0 }
  0xec   : > { %v1165_v19 = vpop.f32.mrf.mxu0  ;;  %1214 = vmatmul.mubr.f32.gmra.mxu1 %v512_v15  ;;  %1289 = vmatprep.subr.mxu1 %v1584_v44 }
  0xed   : > { %v513_v20 = vmax.f32 %v475_v18, 0.0  ;;  %1305 = vmatpush3.msra.mxu1 %v1584_v44  ;;  %v490_v22 = vadd.f32 %v1165_v19, %v1614_v48 }
  0xee   : > { %v484_v23 = vpop.f32.mrf.mxu0  ;;  %1290 = vmatprep.subr.mxu1 %v1591_v45 }
  0xef   : > { %v485_v24 = vadd.f32 %v1614_v48, %v484_v23  ;;  %1216 = vmatprep.mubr.f32.mxu1 %v513_v20  ;;  %1306 = vmatpush3.msra.mxu1 %v1591_v45  ;;  %v516_v27 = vmax.f32 %v490_v22, 0.0  ;;  %v1666_v22 = vld [vmem:[%s1716_s6] ss:$0 sm:$0xff] }
  0xf0   : > { %v1168_v25 = vpop.f32.mrf.mxu0  ;;  %1217 = vmatmul.mubr.f32.gmra.mxu1 %v514_v21  ;;  %1291 = vmatprep.subr.mxu1 %v1598_v46 }
  0xf1   : > { %v515_v26 = vmax.f32 %v485_v24, 0.0  ;;  %1307 = vmatpush3.msra.mxu1 %v1598_v46  ;;  %v500_v28 = vadd.f32 %v1168_v25, %v1614_v48 }
  0xf2   : > { %v494_v29 = vpop.f32.mrf.mxu0  ;;  %1292 = vmatprep.subr.mxu1 %v1605_v47 }
  0xf3   : > { %v495_v30 = vadd.f32 %v1614_v48, %v494_v29  ;;  %1219 = vmatprep.mubr.f32.mxu1 %v515_v26  ;;  %1308 = vmatpush3.msra.mxu1 %v1605_v47  ;;  %v518_v32 = vmax.f32 %v500_v28, 0.0 }
  0xf4   : > { %1220 = vmatmul.mubr.f32.gmra.mxu1 %v516_v27  ;;  %1293 = vmatprep.subr.mxu1 %v706_v33 }
  0xf5   : > { %v517_v31 = vmax.f32 %v495_v30, 0.0  ;;  %1309 = vmatpush3.msra.mxu1 %v706_v33 }
  0xf6   : > { %1294 = vmatprep.subr.mxu1 %v705_v34 }
  0xf7   : > { %1222 = vmatprep.mubr.f32.mxu1 %v517_v31  ;;  %1310 = vmatpush3.msra.mxu1 %v705_v34 }
  0xf8   : > { %1223 = vmatmul.mubr.f32.gmra.mxu1 %v518_v32  ;;  %1295 = vmatprep.subr.mxu1 %v704_v35 }
  0xf9   : > { %1311 = vmatpush3.msra.mxu1 %v704_v35 }
  0xfa   : > { %1296 = vmatprep.subr.mxu1 %v703_v36 }
  0xfb   : > { %1312 = vmatpush3.msra.mxu1 %v703_v36 }
 0x19c   : > { %v1203_v38 = vpop.f32.mrf.mxu1 }
 0x19d   : > { %v614_v39 = vadd.f32 %v1203_v38, %v1049_v37 }
 0x19e   : > { %v608_v40 = vpop.f32.mrf.mxu1 }
 0x19f   : > { %v609_v41 = vadd.f32 %v1049_v37, %v608_v40  ;;  %v688_v44 = vmax.f32 %v614_v39, 0.0 }
 0x1a0   : > { %v1206_v42 = vpop.f32.mrf.mxu1 }
 0x1a1   : > { %v687_v43 = vmax.f32 %v609_v41, 0.0  ;;  %v624_v45 = vadd.f32 %v1206_v42, %v1049_v37 }
 0x1a2   : > { %v618_v46 = vpop.f32.mrf.mxu1 }
 0x1a3   : > { %v619_v47 = vadd.f32 %v1049_v37, %v618_v46  ;;  %1257 = vmatprep.mubr.f32.mxu0 %v687_v43  ;;  %v690_v50 = vmax.f32 %v624_v45, 0.0 }
 0x1a4   : > { %v1209_v48 = vpop.f32.mrf.mxu1  ;;  %1258 = vmatmul.mubr.f32.vlgmr.msra.gmra.mxu0 %v688_v44 }
 0x1a5   : > { %v689_v49 = vmax.f32 %v619_v47, 0.0  ;;  %v634_v51 = vadd.f32 %v1209_v48, %v1049_v37 }
 0x1a6   : > { %v628_v52 = vpop.f32.mrf.mxu1 }
 0x1a7   : > { %v629_v53 = vadd.f32 %v1049_v37, %v628_v52  ;;  %1260 = vmatprep.mubr.f32.mxu0 %v689_v49  ;;  %v692_v56 = vmax.f32 %v634_v51, 0.0 }
 0x1a8   : > { %v1212_v54 = vpop.f32.mrf.mxu1  ;;  %1261 = vmatmul.mubr.f32.gmra.mxu0 %v690_v50 }
 0x1a9   : > { %v691_v55 = vmax.f32 %v629_v53, 0.0  ;;  %v644_v57 = vadd.f32 %v1212_v54, %v1049_v37 }
 0x1aa   : > { %v638_v58 = vpop.f32.mrf.mxu1 }
 0x1ab   : > { %v639_v59 = vadd.f32 %v1049_v37, %v638_v58  ;;  %1263 = vmatprep.mubr.f32.mxu0 %v691_v55  ;;  %v694_v62 = vmax.f32 %v644_v57, 0.0 }
 0x1ac   : > { %v1215_v60 = vpop.f32.mrf.mxu1  ;;  %1264 = vmatmul.mubr.f32.gmra.mxu0 %v692_v56 }
 0x1ad   : > { %v693_v61 = vmax.f32 %v639_v59, 0.0  ;;  %v654_v63 = vadd.f32 %v1215_v60, %v1049_v37 }
 0x1ae   : > { %v648_v0 = vpop.f32.mrf.mxu1 }
 0x1af   : > { %v649_v1 = vadd.f32 %v1049_v37, %v648_v0  ;;  %1266 = vmatprep.mubr.f32.mxu0 %v693_v61  ;;  %v696_v4 = vmax.f32 %v654_v63, 0.0 }
 0x1b0   : > { %v1218_v2 = vpop.f32.mrf.mxu1  ;;  %1267 = vmatmul.mubr.f32.gmra.mxu0 %v694_v62 }
 0x1b1   : > { %v695_v3 = vmax.f32 %v649_v1, 0.0  ;;  %v664_v5 = vadd.f32 %v1218_v2, %v1049_v37 }
 0x1b2   : > { %v658_v6 = vpop.f32.mrf.mxu1 }
 0x1b3   : > { %v659_v7 = vadd.f32 %v1049_v37, %v658_v6  ;;  %1269 = vmatprep.mubr.f32.mxu0 %v695_v3  ;;  %v698_v10 = vmax.f32 %v664_v5, 0.0 }
 0x1b4   : > { %v1221_v8 = vpop.f32.mrf.mxu1  ;;  %1270 = vmatmul.mubr.f32.gmra.mxu0 %v696_v4 }
 0x1b5   : > { %v697_v9 = vmax.f32 %v659_v7, 0.0  ;;  %v674_v11 = vadd.f32 %v1221_v8, %v1049_v37 }
 0x1b6   : > { %v668_v12 = vpop.f32.mrf.mxu1 }
 0x1b7   : > { %v669_v13 = vadd.f32 %v1049_v37, %v668_v12  ;;  %1272 = vmatprep.mubr.f32.mxu0 %v697_v9  ;;  %v700_v16 = vmax.f32 %v674_v11, 0.0 }
 0x1b8   : > { %v1224_v14 = vpop.f32.mrf.mxu1  ;;  %1273 = vmatmul.mubr.f32.gmra.mxu0 %v698_v10 }
 0x1b9   : > { %v699_v15 = vmax.f32 %v669_v13, 0.0  ;;  %v684_v17 = vadd.f32 %v1224_v14, %v1049_v37 }
 0x1ba   : > { %v678_v18 = vpop.f32.mrf.mxu1 }
 0x1bb   : > { %v679_v19 = vadd.f32 %v1049_v37, %v678_v18  ;;  %1275 = vmatprep.mubr.f32.mxu0 %v699_v15  ;;  %v702_v21 = vmax.f32 %v684_v17, 0.0 }
 0x1bc   : > { %1276 = vmatmul.mubr.f32.gmra.mxu0 %v700_v16 }
 0x1bd   : > { %v701_v20 = vmax.f32 %v679_v19, 0.0 }
 0x1bf   : > { %1278 = vmatprep.mubr.f32.mxu1 %v701_v20 }
 0x1c0   : > { %1279 = vmatmul.mubr.f32.vlgmr.msra.gmra.mxu1 %v702_v21 }
 0x264   : > { %v1259_v23 = vpop.f32.mrf.mxu0 }
 0x265   : > { %v798_v24 = vadd.f32 %v1259_v23, %v1666_v22 }
 0x266   : > { %v792_v25 = vpop.f32.mrf.mxu0 }
 0x267   : > { %v872_v26 = vsub.f32 0.0, %v798_v24  ;;  %v793_v27 = vadd.f32 %v1666_v22, %v792_v25 }
 0x268   : > { %v1262_v28 = vpop.f32.mrf.mxu0 }
 0x269   : > { %v889_v29 = vmul.f32 1.442695, %v872_v26  ;;  %v871_v30 = vsub.f32 0.0, %v793_v27  ;;  %v808_v31 = vadd.f32 %v1262_v28, %v1666_v22 }
 0x26a   : > { %v802_v32 = vpop.f32.mrf.mxu0 }
 0x26b   : > { %1321 = vpow2.f32 %v889_v29  ;;  %v887_v33 = vmul.f32 1.442695, %v871_v30  ;;  %v874_v34 = vsub.f32 0.0, %v808_v31  ;;  %v803_v35 = vadd.f32 %v1666_v22, %v802_v32 }
 0x26c   : > { %v1265_v36 = vpop.f32.mrf.mxu0 }
 0x26d   : > { %1323 = vpow2.f32 %v887_v33  ;;  %v893_v37 = vmul.f32 1.442695, %v874_v34  ;;  %v873_v38 = vsub.f32 0.0, %v803_v35  ;;  %v818_v39 = vadd.f32 %v1265_v36, %v1666_v22 }
 0x26e   : > { %v812_v40 = vpop.f32.mrf.mxu0 }
 0x26f   : > { %1325 = vpow2.f32 %v893_v37  ;;  %v891_v41 = vmul.f32 1.442695, %v873_v38  ;;  %v876_v42 = vsub.f32 0.0, %v818_v39  ;;  %v813_v43 = vadd.f32 %v1666_v22, %v812_v40 }
 0x270   : > { %v1268_v44 = vpop.f32.mrf.mxu0 }
 0x271   : > { %1327 = vpow2.f32 %v891_v41  ;;  %v897_v45 = vmul.f32 1.442695, %v876_v42  ;;  %v875_v46 = vsub.f32 0.0, %v813_v43  ;;  %v828_v47 = vadd.f32 %v1268_v44, %v1666_v22 }
 0x272   : > { %v822_v48 = vpop.f32.mrf.mxu0 }
 0x273   : > { %1329 = vpow2.f32 %v897_v45  ;;  %v895_v49 = vmul.f32 1.442695, %v875_v46  ;;  %v878_v50 = vsub.f32 0.0, %v828_v47  ;;  %v823_v51 = vadd.f32 %v1666_v22, %v822_v48 }
 0x274   : > { %v1271_v52 = vpop.f32.mrf.mxu0 }
 0x275   : > { %1331 = vpow2.f32 %v895_v49  ;;  %v901_v53 = vmul.f32 1.442695, %v878_v50  ;;  %v877_v54 = vsub.f32 0.0, %v823_v51  ;;  %v838_v55 = vadd.f32 %v1271_v52, %v1666_v22 }
 0x276   : > { %v832_v56 = vpop.f32.mrf.mxu0 }
 0x277   : > { %1333 = vpow2.f32 %v901_v53  ;;  %v899_v57 = vmul.f32 1.442695, %v877_v54  ;;  %v880_v58 = vsub.f32 0.0, %v838_v55  ;;  %v833_v59 = vadd.f32 %v1666_v22, %v832_v56 }
 0x278   : > { %v1322_v60 = vpop.eup %1321  ;;  %v1274_v61 = vpop.f32.mrf.mxu0 }
 0x279   : > { %v920_v62 = vadd.f32 1.0, %v1322_v60  ;;  %1335 = vpow2.f32 %v899_v57  ;;  %v905_v63 = vmul.f32 1.442695, %v880_v58  ;;  %v879_v0 = vsub.f32 0.0, %v833_v59 }
 0x27a   : > { %v1324_v1 = vpop.eup %1323  ;;  %v848_v2 = vadd.f32 %v1274_v61, %v1666_v22  ;;  %v842_v3 = vpop.f32.mrf.mxu0 }
 0x27b   : > { %1337 = vrcp.f32 %v920_v62  ;;  %v919_v4 = vadd.f32 1.0, %v1324_v1  ;;  %v903_v5 = vmul.f32 1.442695, %v879_v0  ;;  %v843_v6 = vadd.f32 %v1666_v22, %v842_v3 }
 0x27c   : > { %v1326_v7 = vpop.eup %1325  ;;  %1339 = vpow2.f32 %v905_v63  ;;  %v882_v8 = vsub.f32 0.0, %v848_v2  ;;  %v1277_v9 = vpop.f32.mrf.mxu0 }
 0x27d   : > { %1341 = vrcp.f32 %v919_v4  ;;  %v922_v10 = vadd.f32 1.0, %v1326_v7  ;;  %v881_v11 = vsub.f32 0.0, %v843_v6  ;;  %v858_v12 = vadd.f32 %v1277_v9, %v1666_v22 }
 0x27e   : > { %v1328_v13 = vpop.eup %1327  ;;  %1343 = vpow2.f32 %v903_v5  ;;  %v909_v14 = vmul.f32 1.442695, %v882_v8  ;;  %v852_v15 = vpop.f32.mrf.mxu0 }
 0x27f   : > { %1345 = vrcp.f32 %v922_v10  ;;  %v921_v16 = vadd.f32 1.0, %v1328_v13  ;;  %v907_v17 = vmul.f32 1.442695, %v881_v11  ;;  %v884_v18 = vsub.f32 0.0, %v858_v12 }
 0x280   : > { %v1330_v19 = vpop.eup %1329  ;;  %1347 = vpow2.f32 %v909_v14  ;;  %v853_v20 = vadd.f32 %v1666_v22, %v852_v15  ;;  %v1280_v21 = vpop.f32.mrf.mxu1 }
 0x281   : > { %1349 = vrcp.f32 %v921_v16  ;;  %v924_v23 = vadd.f32 1.0, %v1330_v19  ;;  %v913_v24 = vmul.f32 1.442695, %v884_v18  ;;  %v868_v25 = vadd.f32 %v1280_v21, %v1666_v22 }
 0x282   : > { %v1332_v26 = vpop.eup %1331  ;;  %1351 = vpow2.f32 %v907_v17  ;;  %v883_v27 = vsub.f32 0.0, %v853_v20  ;;  %v862_v28 = vpop.f32.mrf.mxu1 }
 0x283   : > { %1353 = vrcp.f32 %v924_v23  ;;  %v923_v29 = vadd.f32 1.0, %v1332_v26  ;;  %v886_v30 = vsub.f32 0.0, %v868_v25  ;;  %v863_v31 = vadd.f32 %v1666_v22, %v862_v28 }
 0x284   : > { %v1334_v32 = vpop.eup %1333  ;;  %1355 = vpow2.f32 %v913_v24  ;;  %v911_v33 = vmul.f32 1.442695, %v883_v27 }
 0x285   : > { %1357 = vrcp.f32 %v923_v29  ;;  %v926_v34 = vadd.f32 1.0, %v1334_v32  ;;  %v917_v35 = vmul.f32 1.442695, %v886_v30  ;;  %v885_v36 = vsub.f32 0.0, %v863_v31 }
 0x286   : > { %v1336_v37 = vpop.eup %1335  ;;  %1359 = vpow2.f32 %v911_v33 }
 0x287   : > { %1361 = vrcp.f32 %v926_v34  ;;  %v925_v38 = vadd.f32 1.0, %v1336_v37  ;;  %v915_v22 = vmul.f32 1.442695, %v885_v36 }
 0x288   : > { %v1338_v39 = vpop.eup %1337  ;;  %1363 = vpow2.f32 %v917_v35 }
 0x289   : > { %v1340_v40 = vpop.eup %1339  ;;  %952 = vst [vmem:[%s1689_s29 + $0x8] sm:$0xff] %v1338_v39  ;;  %1365 = vrcp.f32 %v925_v38 }
 0x28a   : > { %v1342_v41 = vpop.eup %1341  ;;  %v928_v42 = vadd.f32 1.0, %v1340_v40  ;;  %1367 = vpow2.f32 %v915_v22 }
 0x28b   : > { %v1344_v43 = vpop.eup %1343  ;;  %951 = vst [vmem:[%s1689_s29] sm:$0xff] %v1342_v41 }
 0x28c   : > { %v1346_v44 = vpop.eup %1345  ;;  %1369 = vrcp.f32 %v928_v42  ;;  %v927_v45 = vadd.f32 1.0, %v1344_v43 }
 0x28d   : > { %v1348_v46 = vpop.eup %1347  ;;  %954 = vst [vmem:[%s1689_s29 + $0x18] sm:$0xff] %v1346_v44 }
 0x28e   : > { %v1350_v47 = vpop.eup %1349  ;;  %1371 = vrcp.f32 %v927_v45  ;;  %v930_v48 = vadd.f32 1.0, %v1348_v46 }
 0x28f   : > { %v1352_v49 = vpop.eup %1351  ;;  %953 = vst [vmem:[%s1689_s29 + $0x10] sm:$0xff] %v1350_v47 }
 0x290   : > { %v1354_v50 = vpop.eup %1353  ;;  %1373 = vrcp.f32 %v930_v48  ;;  %v929_v51 = vadd.f32 1.0, %v1352_v49 }
 0x291   : > { %v1356_v52 = vpop.eup %1355  ;;  %956 = vst [vmem:[%s1689_s29 + $0x28] sm:$0xff] %v1354_v50 }
 0x292   : > { %v1358_v53 = vpop.eup %1357  ;;  %1375 = vrcp.f32 %v929_v51  ;;  %v932_v54 = vadd.f32 1.0, %v1356_v52 }
 0x293   : > { %v1360_v55 = vpop.eup %1359  ;;  %955 = vst [vmem:[%s1689_s29 + $0x20] sm:$0xff] %v1358_v53 }
 0x294   : > { %v1362_v56 = vpop.eup %1361  ;;  %1377 = vrcp.f32 %v932_v54  ;;  %v931_v57 = vadd.f32 1.0, %v1360_v55 }
 0x295   : > { %v1364_v58 = vpop.eup %1363  ;;  %958 = vst [vmem:[%s1689_s29 + $0x38] sm:$0xff] %v1362_v56 }
 0x296   : > { %v1366_v59 = vpop.eup %1365  ;;  %1379 = vrcp.f32 %v931_v57  ;;  %v934_v60 = vadd.f32 1.0, %v1364_v58 }
 0x297   : > { %v1368_v61 = vpop.eup %1367  ;;  %957 = vst [vmem:[%s1689_s29 + $0x30] sm:$0xff] %v1366_v59 }
 0x298   : > { %1381 = vrcp.f32 %v934_v60  ;;  %v933_v62 = vadd.f32 1.0, %v1368_v61 }
 0x299   : > { %v1370_v63 = vpop.eup %1369 }
 0x29a   : > { %960 = vst [vmem:[%s1689_s29 + $0x48] sm:$0xff] %v1370_v63  ;;  %1383 = vrcp.f32 %v933_v62 }
 0x29b   : > { %v1372_v0 = vpop.eup %1371 }
 0x29c   : > { %959 = vst [vmem:[%s1689_s29 + $0x40] sm:$0xff] %v1372_v0 }
 0x29d   : > { %v1374_v1 = vpop.eup %1373 }
 0x29e   : > { %962 = vst [vmem:[%s1689_s29 + $0x58] sm:$0xff] %v1374_v1 }
 0x29f   : > { %v1376_v2 = vpop.eup %1375 }
 0x2a0   : > { %961 = vst [vmem:[%s1689_s29 + $0x50] sm:$0xff] %v1376_v2 }
 0x2a1   : > { %v1378_v3 = vpop.eup %1377 }
 0x2a2   : > { %964 = vst [vmem:[%s1689_s29 + $0x68] sm:$0xff] %v1378_v3 }
 0x2a3   : > { %v1380_v4 = vpop.eup %1379 }
 0x2a4   : > { %963 = vst [vmem:[%s1689_s29 + $0x60] sm:$0xff] %v1380_v4 }
 0x2a5   : > { %v1382_v5 = vpop.eup %1381 }
 0x2a6   : > { %966 = vst [vmem:[%s1689_s29 + $0x78] sm:$0xff] %v1382_v5 }
 0x2a7   : > { %v1384_v6 = vpop.eup %1383 }
 0x2a8   : > { %965 = vst [vmem:[%s1689_s29 + $0x70] sm:$0xff] %v1384_v6 }
 0x2a9 PF: > { %s17_s24 = sadd.s32 1, %s1391_s24  }
 0x2aa   : > { %p14_p4 = scmp.ge.s32.totalorder %s17_s24, 4  }
 0x2ac   :  { %16 = sbr.rel (!%p14_p4) target bundleno = 1 (0x1), region = 78 }

</bundles_post_ra>
